<compile_context>
chip_gen: v5e
topology: v5e:2x2
jax: 0.10.0
libtpu: 0.0.40
codegen_flags: <defaults>
</compile_context>

<pallas_src>
import math
import functools

import numpy as np
import jax
import jax.numpy as jnp
from jax.experimental import pallas as pl
from jax.experimental.pallas import tpu as pltpu


# ---------------------------------------------------------------------------
# Kernel
# ---------------------------------------------------------------------------
def self_attention_kernel(x_ref, wqkv_ref, bqkv_ref, rsum_ref, asel_ref,
                          wctx_ref, bout_ref, w1_ref, b1_ref, w2_ref, b2_ref,
                          o_ref, *, bb, t, n_qk):
    n_in = x_ref.shape[1]

    # (bb, n_in, T) NCT block -> one (bb*T, n_in) activation slab with a
    # single fused transpose+reshape relayout (no per-batch transposes, no
    # concatenate copy).
    x2d = jnp.transpose(x_ref[...], (0, 2, 1)).reshape(bb * t, n_in)  # f32

    def mm(a, w_ref, b_ref=None):
        # Each activation slab feeds exactly one dot (QKV is fused), so the
        # cast-to-matmul-dtype here happens once per slab.
        w = w_ref[...]
        r = jnp.dot(a.astype(w.dtype), w, preferred_element_type=jnp.float32)
        if b_ref is not None:
            r = r + b_ref[...]          # biases stay f32
        return r

    # Fused, head-pair-replicated Q/K/V projection (head gather + 1/sqrt(K)
    # scale already folded into the weights): one MXU matmul, N = H*H*(2K+V).
    proj = mm(x2d, wqkv_ref, bqkv_ref)          # (M, 2*n_qk + n_v)  f32
    q_rep = proj[:, :n_qk]                      # (M, H*H*K)
    k_rep = proj[:, n_qk:2 * n_qk]              # (M, H*H*K)
    v_rep = proj[:, 2 * n_qk:]                  # (M, H*H*V)

    # scores[m, h1*H+h2] = sum_k q[m,h1,k]*k[m,h2,k]; the k-reduction runs on
    # the MXU via a constant 0/1 block-diagonal matrix (no per-head lane
    # slicing, no XLU loop reductions).
    scores = mm(q_rep * k_rep, rsum_ref)        # (M, H*H)  f32

    # Softmax over TIME per batch element (== torch.softmax(scores, dim=1) on
    # the (B, T, H, H) scores).  Exact division: denom is tiny, the EUP is not
    # the bottleneck here.
    # NOTE: this block covers the full time axis; if T is ever tiled across
    # the grid this must become an online (running max/sum) softmax.
    hh = scores.shape[-1]
    s3 = scores.reshape(bb, t, hh)
    m_ = jnp.max(s3, axis=1, keepdims=True)
    e = jnp.exp(s3 - m_)
    denom = jnp.sum(e, axis=1, keepdims=True)
    attn = (e / denom).reshape(bb * t, hh)      # f32

    # context + out_linear: replicate attn over value lanes (MXU matmul),
    # multiply with v_rep; the h2-reduction and out_linear are a single folded
    # matmul (Csum @ W_out precomputed in the wrapper).
    a_rep = mm(attn, asel_ref)                          # (M, H*H*V)
    attn_out = mm(a_rep * v_rep, wctx_ref, bout_ref)    # (M, n_in)

    # residual + feed-forward (1x1 conv -> ReLU -> 1x1 conv) + residual
    out1 = attn_out + x2d
    hidden = jnp.maximum(mm(out1, w1_ref, b1_ref), 0.0)
    ff = mm(hidden, w2_ref, b2_ref)
    y = ff + x2d                                        # (M, n_in)  f32

    # Single bulk store back in NCT layout (lane-dense whenever T >= 128).
    o_ref[...] = jnp.transpose(y.reshape(bb, t, n_in), (0, 2, 1)).astype(o_ref.dtype)


# ---------------------------------------------------------------------------
# Trace-time parameter folding
# ---------------------------------------------------------------------------
def _fold_params(params, n_head, n_key, n_value, matmul_dtype):
    """Fold head slicing, head-pair replication, 1/sqrt(n_key) scaling and the
    context->out_linear reduction into the weight matrices (trace-time only).
    The Q/K/V projections are fused into a single weight."""
    H, K, V = n_head, n_key, n_value
    S = 2 * K + V
    HH = H * H

    wqkv = params["w_qkv"].T            # (n_in, H*S)  kernel layout: x @ W
    bqkv = params["b_qkv"]              # (H*S,)
    wout = params["w_out"].T            # (H*V, n_in)
    bout = params["b_out"][None, :]     # (1, n_in)
    w1 = params["w_ff1"].T              # (n_in, n_hid)
    b1 = params["b_ff1"][None, :]
    w2 = params["w_ff2"].T              # (n_hid, n_in)
    b2 = params["b_ff2"][None, :]

    # Column gathers for every (h1, h2) head pair, fused into ONE projection:
    # columns = [q for all pairs | k for all pairs | v for all pairs].
    h1 = np.repeat(np.arange(H), H)                                          # (H*H,)
    h2 = np.tile(np.arange(H), H)                                            # (H*H,)
    q_cols = (h1[:, None] * S + np.arange(K)[None, :]).reshape(-1)           # (H*H*K,)
    k_cols = (h2[:, None] * S + K + np.arange(K)[None, :]).reshape(-1)       # (H*H*K,)
    v_cols = (h2[:, None] * S + 2 * K + np.arange(V)[None, :]).reshape(-1)   # (H*H*V,)
    cols = np.concatenate([q_cols, k_cols, v_cols])

    scale_vec = np.ones(cols.shape[0], np.float32)
    scale_vec[:HH * K] = 1.0 / math.sqrt(K)            # fold q scaling in
    scale_vec = jnp.asarray(scale_vec)

    wqkv_f = wqkv[:, cols] * scale_vec[None, :]        # (n_in, HH*(2K+V))
    bqkv_f = (bqkv[cols] * scale_vec)[None, :]         # (1,   HH*(2K+V))

    # Constant 0/1 reduction / replication matrices (MXU-side reductions).
    rsum = jnp.asarray(np.arange(HH * K)[:, None] // K == np.arange(HH)[None, :],
                       dtype=jnp.float32)              # (H*H*K, H*H)
    asel = jnp.asarray(np.arange(HH)[:, None] == np.arange(HH * V)[None, :] // V,
                       dtype=jnp.float32)              # (H*H, H*H*V)
    s_idx = np.arange(HH * V)[:, None]
    c_idx = np.arange(H * V)[None, :]
    csum = ((s_idx // V) // H == c_idx // V) & (s_idx % V == c_idx % V)
    wctx = jnp.asarray(csum, jnp.float32) @ wout       # (H*H*V, n_in)

    mats = dict(wqkv=wqkv_f, bqkv=bqkv_f, rsum=rsum, asel=asel,
                wctx=wctx, bout=bout, w1=w1, b1=b1, w2=w2, b2=b2)
    if matmul_dtype != jnp.float32:
        # bf16 MXU inputs (v5e/v6e/v7x MXUs are bf16-native); biases, softmax
        # and residual math stay f32.  No int8 path: v7x MXU is bf16/fp8 only.
        for name in ("wqkv", "rsum", "asel", "wctx", "w1", "w2"):
            mats[name] = mats[name].astype(matmul_dtype)
    return mats


def _vmem_estimate_bytes(bb, t, n_in, n_hid, n_head, n_key, n_value, mm_bytes):
    """Rough per-grid-step VMEM footprint (bytes)."""
    f32 = 4
    M = bb * t
    HH = n_head * n_head
    nqk, nv = HH * n_key, HH * n_value
    nproj = 2 * nqk + nv
    io = 2 * (2 * bb * n_in * t * f32)        # double-buffered x / out NCT blocks
    w = mm_bytes * (n_in * nproj + nqk * HH + HH * nv + nv * n_in
                    + n_in * n_hid + n_hid * n_in)
    b = f32 * (nproj + 2 * n_in + n_hid)
    inter = f32 * M * (2 * nproj + 2 * HH + nv + 4 * n_in + n_hid)
    # Weights use a constant index_map (fetched once, reused every step), but
    # count them x2 in case the pipeliner still double-buffers them.
    return io + 2 * (w + b) + inter


_VMEM_BUDGET = 40 * 1024 * 1024      # conservative vs v7x's 64 MiB physical VMEM


# ---------------------------------------------------------------------------
# Wrapper
# ---------------------------------------------------------------------------
def self_attention_forward(x_nct, params, n_head, n_key, n_value, *,
                           matmul_dtype=jnp.bfloat16, block_batch=None,
                           target_rows=512):
    """x_nct: (B, n_in, T) like the PyTorch module. Returns (B, n_in, T)."""
    B, n_in, T = x_nct.shape
    n_hid = params["w_ff1"].shape[0]
    HH = n_head * n_head
    mats = _fold_params(params, n_head, n_key, n_value, matmul_dtype)
    mm_bytes = np.dtype(matmul_dtype).itemsize

    # Batch-block size: aim for ~target_rows rows per matmul, but
    #  * keep >= 2 grid blocks when B >= 2 so the "parallel" batch axis can
    #    shard across both v7x TensorCores, and
    #  * clamp against the VMEM budget (re-derived for 64 MiB chips).
    if block_batch is not None:
        bb = int(block_batch)
    else:
        bb = max(1, min(B, max(1, target_rows // max(T, 1))))
        if B >= 2:
            bb = min(bb, -(-B // 2))          # ceil(B/2) -> at least 2 blocks
        while bb > 1 and _vmem_estimate_bytes(bb, T, n_in, n_hid, n_head,
                                              n_key, n_value,
                                              mm_bytes) > _VMEM_BUDGET:
            bb -= 1
    n_blocks = -(-B // bb)
    b_pad = n_blocks * bb
    if b_pad != B:
        # Zero-padded rows run through the full pipeline (softmax of constant
        # scores is well-defined, no NaN); they are sliced off at the end.
        x_nct = jnp.pad(x_nct, ((0, b_pad - B), (0, 0), (0, 0)))

    vmem_limit = int(min(max(2 * _vmem_estimate_bytes(bb, T, n_in, n_hid, n_head,
                                                      n_key, n_value, mm_bytes),
                             32 * 1024 * 1024),
                         56 * 1024 * 1024))

    kernel = functools.partial(self_attention_kernel,
                               bb=bb, t=T, n_qk=HH * n_key)

    def full_spec(arr):
        nd = arr.ndim
        # Constant index_map: block fetched once and reused every grid step.
        return pl.BlockSpec(arr.shape, lambda b, nd=nd: (0,) * nd)

    weight_order = ("wqkv", "bqkv", "rsum", "asel", "wctx", "bout",
                    "w1", "b1", "w2", "b2")
    weights = [mats[k] for k in weight_order]

    out = pl.pallas_call(
        kernel,
        out_shape=jax.ShapeDtypeStruct((b_pad, n_in, T), x_nct.dtype),
        grid_spec=pltpu.PrefetchScalarGridSpec(
            num_scalar_prefetch=0,
            grid=(n_blocks,),
            in_specs=[pl.BlockSpec((bb, n_in, T), lambda b: (b, 0, 0))]
                     + [full_spec(w) for w in weights],
            # NOTE: NCT output is lane-dense (unmasked vst) only for T >= 128;
            # for T < 128 the store is masked — accepted knowingly.
            out_specs=pl.BlockSpec((bb, n_in, T), lambda b: (b, 0, 0)),
        ),
        compiler_params=pltpu.CompilerParams(
            dimension_semantics=("parallel",),   # batch blocks are independent
            vmem_limit_bytes=vmem_limit),
    )(x_nct, *weights)

    return out[:B] if b_pad != B else out


# ---------------------------------------------------------------------------
# Pure-JAX reference (mirror of the PyTorch module)
# ---------------------------------------------------------------------------
def ref_forward(x, params, n_head, n_key, n_value):
    B, n_in, T = x.shape
    S = 2 * n_key + n_value
    conv = lambda w, b, a: jnp.einsum("oi,bit->bot", w, a) + b[None, :, None]

    qkv = conv(params["w_qkv"], params["b_qkv"], x).reshape(B, n_head, S, T)
    q = qkv[:, :, :n_key, :] / math.sqrt(n_key)
    k = qkv[:, :, n_key:2 * n_key, :]
    v = qkv[:, :, 2 * n_key:, :]
    scores = jnp.matmul(jnp.transpose(q, (0, 3, 1, 2)),
                        jnp.transpose(k, (0, 3, 2, 1)))          # (B,T,H,H)
    attn = jax.nn.softmax(scores, axis=1)                        # over time!
    context = jnp.matmul(attn, jnp.transpose(v, (0, 3, 1, 2)))   # (B,T,H,V)
    context = jnp.transpose(context, (0, 2, 3, 1)).reshape(B, n_head * n_value, T)
    attn_out = conv(params["w_out"], params["b_out"], context)
    out1 = attn_out + x
    h = jax.nn.relu(conv(params["w_ff1"], params["b_ff1"], out1))
    ff = conv(params["w_ff2"], params["b_ff2"], h)
    return ff + x


if __name__ == "__main__":
    # small shapes consistent with the module
    B, n_in, T = 2, 32, 16
    n_head = 4
    n_key = n_in // n_head           # 8
    n_value = n_in // n_head         # 8
    n_hid = 64
    S = 2 * n_key + n_value          # 24

    key = jax.random.PRNGKey(0)
    ks = jax.random.split(key, 9)

    def uinit(k, shape, fan_in):
        bound = 1.0 / math.sqrt(fan_in)
        return jax.random.uniform(k, shape, jnp.float32, -bound, bound)

    # PyTorch-layout weights: Conv1d(k=1) weight (out, in), bias (out,)
    params = {
        "w_qkv": uinit(ks[0], (n_head * S, n_in), n_in),
        "b_qkv": uinit(ks[1], (n_head * S,), n_in),
        "w_out": uinit(ks[2], (n_in, n_head * n_value), n_head * n_value),
        "b_out": uinit(ks[3], (n_in,), n_head * n_value),
        "w_ff1": uinit(ks[4], (n_hid, n_in), n_in),
        "b_ff1": uinit(ks[5], (n_hid,), n_in),
        "w_ff2": uinit(ks[6], (n_in, n_hid), n_hid),
        "b_ff2": uinit(ks[7], (n_in,), n_hid),
    }
    # TODO(synk): nn.Dropout (p=0) and the `self.attn` attribute cache are
    # omitted; they do not affect the returned tensor in eval mode.

    x = jax.random.normal(ks[8], (B, n_in, T), jnp.float32)   # NCT like PyTorch

    ref = ref_forward(x, params, n_head, n_key, n_value)

    # Exact-semantics path (f32 MXU inputs, exact softmax division).
    out_f32 = jax.block_until_ready(
        self_attention_forward(x, params, n_head, n_key, n_value,
                               matmul_dtype=jnp.float32))
    assert out_f32.shape == (B, n_in, T)
    err_f32 = float(jnp.max(jnp.abs(out_f32 - ref)))
    assert jnp.allclose(out_f32, ref, atol=2e-3, rtol=2e-3), \
        f"f32 max abs err {err_f32}"

    # Default fast path (bf16 MXU inputs; softmax / residual math stays f32).
    out_bf16 = jax.block_until_ready(
        self_attention_forward(x, params, n_head, n_key, n_value))
    err_bf16 = float(jnp.max(jnp.abs(out_bf16 - ref)))
    assert jnp.allclose(out_bf16, ref, atol=1e-1, rtol=1e-1), \
        f"bf16 max abs err {err_bf16}"

    print("KERNEL_OK")
</pallas_src>

<mosaic_0001>
module attributes {stable_mosaic.version = 11 : i64} {
  func.func @self_attention_kernel(%arg0: i32, %arg1: memref<1x32x16xf32, #tpu.memory_space<vmem>>, %arg2: memref<32x384xf32, #tpu.memory_space<vmem>>, %arg3: memref<1x384xf32, #tpu.memory_space<vmem>>, %arg4: memref<128x16xf32, #tpu.memory_space<vmem>>, %arg5: memref<16x128xf32, #tpu.memory_space<vmem>>, %arg6: memref<128x32xf32, #tpu.memory_space<vmem>>, %arg7: memref<1x32xf32, #tpu.memory_space<vmem>>, %arg8: memref<32x64xf32, #tpu.memory_space<vmem>>, %arg9: memref<1x64xf32, #tpu.memory_space<vmem>>, %arg10: memref<64x32xf32, #tpu.memory_space<vmem>>, %arg11: memref<1x32xf32, #tpu.memory_space<vmem>>, %arg12: memref<1x32x16xf32, #tpu.memory_space<vmem>>) attributes {dimension_semantics = [#tpu.dimension_semantics<parallel>], iteration_bounds = array<i64: 2>, scalar_prefetch = 0 : i64, scratch_operands = 0 : i64, tpu.core_type = #tpu.core_type<tc>, window_params = [{transform_indices = @transform_0, window_bounds = array<i64: 1, 32, 16>}, {pipeline_mode = #tpu.pipeline_mode<synchronous>, transform_indices = @transform_1, window_bounds = array<i64: 32, 384>}, {pipeline_mode = #tpu.pipeline_mode<synchronous>, transform_indices = @transform_2, window_bounds = array<i64: 1, 384>}, {pipeline_mode = #tpu.pipeline_mode<synchronous>, transform_indices = @transform_3, window_bounds = array<i64: 128, 16>}, {pipeline_mode = #tpu.pipeline_mode<synchronous>, transform_indices = @transform_4, window_bounds = array<i64: 16, 128>}, {pipeline_mode = #tpu.pipeline_mode<synchronous>, transform_indices = @transform_5, window_bounds = array<i64: 128, 32>}, {pipeline_mode = #tpu.pipeline_mode<synchronous>, transform_indices = @transform_6, window_bounds = array<i64: 1, 32>}, {pipeline_mode = #tpu.pipeline_mode<synchronous>, transform_indices = @transform_7, window_bounds = array<i64: 32, 64>}, {pipeline_mode = #tpu.pipeline_mode<synchronous>, transform_indices = @transform_8, window_bounds = array<i64: 1, 64>}, {pipeline_mode = #tpu.pipeline_mode<synchronous>, transform_indices = @transform_9, window_bounds = array<i64: 64, 32>}, {pipeline_mode = #tpu.pipeline_mode<synchronous>, transform_indices = @transform_10, window_bounds = array<i64: 1, 32>}, {transform_indices = @transform_11, window_bounds = array<i64: 1, 32, 16>}]} {
    %c0 = arith.constant 0 : index
    %c0_0 = arith.constant 0 : index
    %c0_1 = arith.constant 0 : index
    %0 = vector.load %arg1[%c0, %c0_0, %c0_1] : memref<1x32x16xf32, #tpu.memory_space<vmem>>, vector<1x32x16xf32>
    %1 = tpu.transpose %0, [0, 2, 1] : vector<1x32x16xf32> -> vector<1x16x32xf32>
    %2 = vector.shape_cast %1 : vector<1x16x32xf32> to vector<16x32xf32>
    %c0_2 = arith.constant 0 : index
    %c0_3 = arith.constant 0 : index
    %3 = vector.load %arg2[%c0_2, %c0_3] : memref<32x384xf32, #tpu.memory_space<vmem>>, vector<32x384xf32>
    %cst = arith.constant dense<0.000000e+00> : vector<16x384xf32>
    %4 = tpu.matmul %2, %3, %cst {dimension_numbers = #tpu.dot_dimension_numbers<[1], [0], [0], [1], [0, 0, 1, 1], [], []>} : vector<16x32xf32>, vector<32x384xf32>, vector<16x384xf32> -> vector<16x384xf32>
    %c0_4 = arith.constant 0 : index
    %c0_5 = arith.constant 0 : index
    %5 = vector.load %arg3[%c0_4, %c0_5] : memref<1x384xf32, #tpu.memory_space<vmem>>, vector<1x384xf32>
    %6 = vector.broadcast %5 : vector<1x384xf32> to vector<16x384xf32>
    %7 = arith.addf %4, %6 : vector<16x384xf32>
    %8 = vector.extract_strided_slice %7 {offsets = [0, 0], sizes = [16, 128], strides = [1, 1]} : vector<16x384xf32> to vector<16x128xf32>
    %9 = vector.extract_strided_slice %7 {offsets = [0, 128], sizes = [16, 128], strides = [1, 1]} : vector<16x384xf32> to vector<16x128xf32>
    %10 = vector.extract_strided_slice %7 {offsets = [0, 256], sizes = [16, 128], strides = [1, 1]} : vector<16x384xf32> to vector<16x128xf32>
    %11 = arith.mulf %8, %9 : vector<16x128xf32>
    %c0_6 = arith.constant 0 : index
    %c0_7 = arith.constant 0 : index
    %12 = vector.load %arg4[%c0_6, %c0_7] : memref<128x16xf32, #tpu.memory_space<vmem>>, vector<128x16xf32>
    %cst_8 = arith.constant dense<0.000000e+00> : vector<16x16xf32>
    %13 = tpu.matmul %11, %12, %cst_8 {dimension_numbers = #tpu.dot_dimension_numbers<[1], [0], [0], [1], [0, 0, 1, 1], [], []>} : vector<16x128xf32>, vector<128x16xf32>, vector<16x16xf32> -> vector<16x16xf32>
    %14 = vector.shape_cast %13 : vector<16x16xf32> to vector<1x16x16xf32>
    %cst_9 = arith.constant dense<0xFF800000> : vector<1x16xf32>
    %15 = vector.multi_reduction <maximumf>, %14, %cst_9 [1] : vector<1x16x16xf32> to vector<1x16xf32>
    %16 = vector.shape_cast %15 : vector<1x16xf32> to vector<1x1x16xf32>
    %17 = vector.broadcast %16 : vector<1x1x16xf32> to vector<1x16x16xf32>
    %18 = arith.subf %14, %17 : vector<1x16x16xf32>
    %19 = math.exp %18 : vector<1x16x16xf32>
    %cst_10 = arith.constant dense<0.000000e+00> : vector<1x16xf32>
    %20 = vector.multi_reduction <add>, %19, %cst_10 [1] : vector<1x16x16xf32> to vector<1x16xf32>
    %21 = vector.shape_cast %20 : vector<1x16xf32> to vector<1x1x16xf32>
    %22 = vector.broadcast %21 : vector<1x1x16xf32> to vector<1x16x16xf32>
    %23 = arith.divf %19, %22 : vector<1x16x16xf32>
    %24 = vector.shape_cast %23 : vector<1x16x16xf32> to vector<16x16xf32>
    %c0_11 = arith.constant 0 : index
    %c0_12 = arith.constant 0 : index
    %25 = vector.load %arg5[%c0_11, %c0_12] : memref<16x128xf32, #tpu.memory_space<vmem>>, vector<16x128xf32>
    %cst_13 = arith.constant dense<0.000000e+00> : vector<16x128xf32>
    %26 = tpu.matmul %24, %25, %cst_13 {dimension_numbers = #tpu.dot_dimension_numbers<[1], [0], [0], [1], [0, 0, 1, 1], [], []>} : vector<16x16xf32>, vector<16x128xf32>, vector<16x128xf32> -> vector<16x128xf32>
    %27 = arith.mulf %26, %10 : vector<16x128xf32>
    %c0_14 = arith.constant 0 : index
    %c0_15 = arith.constant 0 : index
    %28 = vector.load %arg6[%c0_14, %c0_15] : memref<128x32xf32, #tpu.memory_space<vmem>>, vector<128x32xf32>
    %cst_16 = arith.constant dense<0.000000e+00> : vector<16x32xf32>
    %29 = tpu.matmul %27, %28, %cst_16 {dimension_numbers = #tpu.dot_dimension_numbers<[1], [0], [0], [1], [0, 0, 1, 1], [], []>} : vector<16x128xf32>, vector<128x32xf32>, vector<16x32xf32> -> vector<16x32xf32>
    %c0_17 = arith.constant 0 : index
    %c0_18 = arith.constant 0 : index
    %30 = vector.load %arg7[%c0_17, %c0_18] : memref<1x32xf32, #tpu.memory_space<vmem>>, vector<1x32xf32>
    %31 = vector.broadcast %30 : vector<1x32xf32> to vector<16x32xf32>
    %32 = arith.addf %29, %31 : vector<16x32xf32>
    %33 = arith.addf %32, %2 : vector<16x32xf32>
    %c0_19 = arith.constant 0 : index
    %c0_20 = arith.constant 0 : index
    %34 = vector.load %arg8[%c0_19, %c0_20] : memref<32x64xf32, #tpu.memory_space<vmem>>, vector<32x64xf32>
    %cst_21 = arith.constant dense<0.000000e+00> : vector<16x64xf32>
    %35 = tpu.matmul %33, %34, %cst_21 {dimension_numbers = #tpu.dot_dimension_numbers<[1], [0], [0], [1], [0, 0, 1, 1], [], []>} : vector<16x32xf32>, vector<32x64xf32>, vector<16x64xf32> -> vector<16x64xf32>
    %c0_22 = arith.constant 0 : index
    %c0_23 = arith.constant 0 : index
    %36 = vector.load %arg9[%c0_22, %c0_23] : memref<1x64xf32, #tpu.memory_space<vmem>>, vector<1x64xf32>
    %37 = vector.broadcast %36 : vector<1x64xf32> to vector<16x64xf32>
    %38 = arith.addf %35, %37 : vector<16x64xf32>
    %cst_24 = arith.constant 0.000000e+00 : f32
    %39 = vector.broadcast %cst_24 : f32 to vector<16x64xf32>
    %40 = arith.maximumf %38, %39 : vector<16x64xf32>
    %c0_25 = arith.constant 0 : index
    %c0_26 = arith.constant 0 : index
    %41 = vector.load %arg10[%c0_25, %c0_26] : memref<64x32xf32, #tpu.memory_space<vmem>>, vector<64x32xf32>
    %cst_27 = arith.constant dense<0.000000e+00> : vector<16x32xf32>
    %42 = tpu.matmul %40, %41, %cst_27 {dimension_numbers = #tpu.dot_dimension_numbers<[1], [0], [0], [1], [0, 0, 1, 1], [], []>} : vector<16x64xf32>, vector<64x32xf32>, vector<16x32xf32> -> vector<16x32xf32>
    %c0_28 = arith.constant 0 : index
    %c0_29 = arith.constant 0 : index
    %43 = vector.load %arg11[%c0_28, %c0_29] : memref<1x32xf32, #tpu.memory_space<vmem>>, vector<1x32xf32>
    %44 = vector.broadcast %43 : vector<1x32xf32> to vector<16x32xf32>
    %45 = arith.addf %42, %44 : vector<16x32xf32>
    %46 = arith.addf %45, %2 : vector<16x32xf32>
    %47 = vector.shape_cast %46 : vector<16x32xf32> to vector<1x16x32xf32>
    %48 = tpu.transpose %47, [0, 2, 1] : vector<1x16x32xf32> -> vector<1x32x16xf32>
    %c0_30 = arith.constant 0 : index
    %c0_31 = arith.constant 0 : index
    %c0_32 = arith.constant 0 : index
    %49 = vector.load %arg12[%c0_30, %c0_31, %c0_32] : memref<1x32x16xf32, #tpu.memory_space<vmem>>, vector<1x32x16xf32>
    tpu.vector_store %arg12[%c0_30, %c0_31, %c0_32], %48 {strides = array<i32>} : memref<1x32x16xf32, #tpu.memory_space<vmem>>, vector<1x32x16xf32>,
    return
  }
  func.func @transform_0(%arg0: i32) -> (i32, i32, i32) {
    %c0_i32 = arith.constant 0 : i32
    %c0_i32_0 = arith.constant 0 : i32
    %c0_i32_1 = arith.constant 0 : i32
    return %arg0, %c0_i32, %c0_i32_0 : i32, i32, i32
  }
  func.func @transform_1(%arg0: i32) -> (i32, i32) {
    %c0_i32 = arith.constant 0 : i32
    %c0_i32_0 = arith.constant 0 : i32
    %c0_i32_1 = arith.constant 0 : i32
    return %c0_i32, %c0_i32_0 : i32, i32
  }
  func.func @transform_2(%arg0: i32) -> (i32, i32) {
    %c0_i32 = arith.constant 0 : i32
    %c0_i32_0 = arith.constant 0 : i32
    %c0_i32_1 = arith.constant 0 : i32
    return %c0_i32, %c0_i32_0 : i32, i32
  }
  func.func @transform_3(%arg0: i32) -> (i32, i32) {
    %c0_i32 = arith.constant 0 : i32
    %c0_i32_0 = arith.constant 0 : i32
    %c0_i32_1 = arith.constant 0 : i32
    return %c0_i32, %c0_i32_0 : i32, i32
  }
  func.func @transform_4(%arg0: i32) -> (i32, i32) {
    %c0_i32 = arith.constant 0 : i32
    %c0_i32_0 = arith.constant 0 : i32
    %c0_i32_1 = arith.constant 0 : i32
    return %c0_i32, %c0_i32_0 : i32, i32
  }
  func.func @transform_5(%arg0: i32) -> (i32, i32) {
    %c0_i32 = arith.constant 0 : i32
    %c0_i32_0 = arith.constant 0 : i32
    %c0_i32_1 = arith.constant 0 : i32
    return %c0_i32, %c0_i32_0 : i32, i32
  }
  func.func @transform_6(%arg0: i32) -> (i32, i32) {
    %c0_i32 = arith.constant 0 : i32
    %c0_i32_0 = arith.constant 0 : i32
    %c0_i32_1 = arith.constant 0 : i32
    return %c0_i32, %c0_i32_0 : i32, i32
  }
  func.func @transform_7(%arg0: i32) -> (i32, i32) {
    %c0_i32 = arith.constant 0 : i32
    %c0_i32_0 = arith.constant 0 : i32
    %c0_i32_1 = arith.constant 0 : i32
    return %c0_i32, %c0_i32_0 : i32, i32
  }
  func.func @transform_8(%arg0: i32) -> (i32, i32) {
    %c0_i32 = arith.constant 0 : i32
    %c0_i32_0 = arith.constant 0 : i32
    %c0_i32_1 = arith.constant 0 : i32
    return %c0_i32, %c0_i32_0 : i32, i32
  }
  func.func @transform_9(%arg0: i32) -> (i32, i32) {
    %c0_i32 = arith.constant 0 : i32
    %c0_i32_0 = arith.constant 0 : i32
    %c0_i32_1 = arith.constant 0 : i32
    return %c0_i32, %c0_i32_0 : i32, i32
  }
  func.func @transform_10(%arg0: i32) -> (i32, i32) {
    %c0_i32 = arith.constant 0 : i32
    %c0_i32_0 = arith.constant 0 : i32
    %c0_i32_1 = arith.constant 0 : i32
    return %c0_i32, %c0_i32_0 : i32, i32
  }
  func.func @transform_11(%arg0: i32) -> (i32, i32, i32) {
    %c0_i32 = arith.constant 0 : i32
    %c0_i32_0 = arith.constant 0 : i32
    %c0_i32_1 = arith.constant 0 : i32
    return %arg0, %c0_i32, %c0_i32_0 : i32, i32, i32
  }
}

</mosaic_0001>

<bundles_post_ra>
// kernel: tpu_custom_call.1
= control target key start
LH: loop header
LB: loop body
LE: loop exit
PB: predicated region body
PF: predicated region fallthrough
CT: control target
= control target key end

     0   :  { %s968_s17 = smov 0   ;;  %s1215_s0 = inlined_call_operand.vmem [shape: f32[2,32,16], index: 0, kind: input, shape index: {}]   ;;  %s1216_s1 = inlined_call_operand.vmem [shape: f32[32,384], index: 1, kind: input, shape index: {}]   ;;  %s1217_s2 = inlined_call_operand.vmem [shape: f32[1,384], index: 2, kind: input, shape index: {}]   ;;  %s1218_s3 = inlined_call_operand.vmem [shape: f32[128,16], index: 3, kind: input, shape index: {}]   ;;  %s1219_s4 = inlined_call_operand.vmem [shape: f32[16,128], index: 4, kind: input, shape index: {}]   ;;  %s1220_s5 = inlined_call_operand.vmem [shape: f32[128,32], index: 5, kind: input, shape index: {}]   ;;  %s1221_s6 = inlined_call_operand.vmem [shape: f32[1,32], index: 6, kind: input, shape index: {}]   ;;  %s1222_s7 = inlined_call_operand.vmem [shape: f32[32,64], index: 7, kind: input, shape index: {}]   ;;  %s1223_s8 = inlined_call_operand.vmem [shape: f32[1,64], index: 8, kind: input, shape index: {}]   ;;  %s1224_s9 = inlined_call_operand.vmem [shape: f32[64,32], index: 9, kind: input, shape index: {}]   ;;  %s1225_s10 = inlined_call_operand.vmem [shape: f32[1,32], index: 10, kind: input, shape index: {}]   ;;  %s1226_s11 = inlined_call_operand.vmem [shape: f32[2,32,16], index: 11, kind: output, shape index: {}]  }
   0x1 LB: > { %s853_s18 = sadd.s32 4294967295, %s906_s17   ;;  %p857_p0 = scmp.ge.s32.totalorder %s906_s17, 1  ;;  %s906_s17 = sphi %s968_s17, %s21_s17  }
   0x2   : > { %p337_p1 = scmp.lt.s32.totalorder %s906_s17, 3 }
   0x4   : > { %p338_p2 = pnand %p857_p0, %p337_p1 }
   0x5   : > { %p377_p3 = scmp.lt.s32.totalorder (!%p338_p2), %s853_s18, 1 }
   0x6   : > { %341 = sbr.rel (%p338_p2) target bundleno = 1231 (0x4cf), region = 64 }
   0xb   : > { %v432_v0 = vld [vmem:[%s1216_s1 + $0x48] sm:$0xff]  ;;  %v433_v1 = vld [vmem:[%s1216_s1 + $0x50] sm:$0xff]  ;;  %v430_v3 = vld [vmem:[%s1216_s1 + $0x38] sm:$0xff]  ;;  %s1228_s18 = smov (!%p377_p3, %s853_s18), 1  ;;  %vm443_vm0 = vcmask 261120   ;;  %vm560_vm1 = vcmask 130048  }
   0xc   : > { %v429_v2 = vld [vmem:[%s1216_s1 + $0x30] sm:$0xff]  ;;  %462 = vmatpush.msra.mxu0 %v432_v0  ;;  %485 = vmatpush.msra.mxu1 %v433_v1  ;;  %v426_v4 = vld [vmem:[%s1216_s1 + $0x18] sm:$0xff]  ;;  %v427_v5 = vld [vmem:[%s1216_s1 + $0x20] sm:$0xff]  ;;  %s876_s12 = sshll.u32 %s1228_s18, 5  ;;  %vm730_vm6 = vcmask 523264  }
   0xd   : > { %878 = vmatpush.msra.mxu2 %v432_v0  ;;  %v423_v6 = vld [vmem:[%s1216_s1] sm:$0xff]  ;;  %s381_s19 = scalar_lea.vmem %s1215_s0, %s876_s12  ;;  %v424_v7 = vld [vmem:[%s1216_s1 + $0x8] sm:$0xff]  ;;  %v434_v12 = vld [vmem:[%s1216_s1 + $0x58] sm:$0xff]  ;;  %s386_s20 = scalar_lea.vmem %s1226_s11, %s876_s12 }
   0xe   : > { %463 = vmatpush.msra.mxu0 %v429_v2  ;;  %486 = vmatpush.msra.mxu1 %v430_v3  ;;  %v387_v8 = vld [vmem:[%s381_s19] sm:$0xff]  ;;  %v388_v9 = vld [vmem:[%s381_s19 + $0x8] sm:$0xff]  ;;  %v389_v10 = vld [vmem:[%s381_s19 + $0x10] sm:$0xff] }
   0xf   : > { %879 = vmatpush.msra.mxu2 %v429_v2  ;;  %391 = vxpose.xlu0.b32.start [1/4] (short) (narrow) %v387_v8, 16  ;;  %v390_v11 = vld [vmem:[%s381_s19 + $0x18] sm:$0xff]  ;;  %v431_v13 = vld [vmem:[%s1216_s1 + $0x40] sm:$0xff]  ;;  %v428_v14 = vld [vmem:[%s1216_s1 + $0x28] sm:$0xff] }
  0x10   : > { %464 = vmatpush.msra.mxu0 %v426_v4  ;;  %487 = vmatpush.msra.mxu1 %v427_v5  ;;  %v425_v15 = vld [vmem:[%s1216_s1 + $0x10] sm:$0xff]  ;;  %v536_v16 = vld [vmem:[%s1218_s3 + $0x78] sm:$0xff]  ;;  %v534_v18 = vld [vmem:[%s1218_s3 + $0x68] sm:$0xff] }
  0x11   : > { %880 = vmatpush.msra.mxu2 %v426_v4  ;;  %v535_v17 = vld [vmem:[%s1218_s3 + $0x70] sm:$0xff]  ;;  %537 = vmatpush.msra.mxu3 %v536_v16  ;;  %v533_v19 = vld [vmem:[%s1218_s3 + $0x60] sm:$0xff]  ;;  %v532_v20 = vld [vmem:[%s1218_s3 + $0x58] sm:$0xff] }
  0x12   : > { %465 = vmatpush.msra.mxu0 %v423_v6  ;;  %488 = vmatpush.msra.mxu1 %v424_v7  ;;  %v531_v22 = vld [vmem:[%s1218_s3 + $0x50] sm:$0xff]  ;;  %v530_v23 = vld [vmem:[%s1218_s3 + $0x48] sm:$0xff]  ;;  %v529_v24 = vld [vmem:[%s1218_s3 + $0x40] sm:$0xff] }
  0x13   : > { %881 = vmatpush.msra.mxu2 %v423_v6  ;;  %538 = vmatpush.msra.mxu3 %v535_v17  ;;  %v528_v25 = vld [vmem:[%s1218_s3 + $0x38] sm:$0xff]  ;;  %v527_v27 = vld [vmem:[%s1218_s3 + $0x30] sm:$0xff]  ;;  %v526_v28 = vld [vmem:[%s1218_s3 + $0x28] sm:$0xff] }
  0x14   : > { %v525_v29 = vld [vmem:[%s1218_s3 + $0x20] sm:$0xff]  ;;  %v524_v30 = vld [vmem:[%s1218_s3 + $0x18] sm:$0xff]  ;;  %v523_v31 = vld [vmem:[%s1218_s3 + $0x10] sm:$0xff] }
  0x15   : > { %508 = vmatpush.msrb.mxu2 %v434_v12  ;;  %539 = vmatpush.msra.mxu3 %v534_v18  ;;  %v522_v32 = vld [vmem:[%s1218_s3 + $0x8] sm:$0xff]  ;;  %v521_v33 = vld [vmem:[%s1218_s3] sm:$0xff]  ;;  %v644_v16 = vld [vmem:[%s1220_s5 + $0x50] sm:$0xff] }
  0x16   : > { %v1087_v34 = vld [vmem:[%s1217_s2] sm:$0x7]  ;;  %v602_v56 = vld [vmem:[%s1219_s4 + $0x8] sm:$0xff] }
  0x17   : > { %392 = vxpose.xlu0.b32.cont [2/4] (short) (narrow) %v388_v9, 16  ;;  %509 = vmatpush.msrb.mxu2 %v431_v13  ;;  %v437_v35 = vperm.slane %v1087_v34, 0  ;;  %v438_v36 = vperm.slane %v1087_v34, 1  ;;  %v601_v57 = vld [vmem:[%s1219_s4] sm:$0xff]  ;;  %v649_v9 = vld [vmem:[%s1220_s5 + $0x78] sm:$0xff]  ;;  %v647_v12 = vld [vmem:[%s1220_s5 + $0x68] sm:$0xff] }
  0x18   : > { %540 = vmatpush.msra.mxu3 %v533_v19  ;;  %623 = vmatpush.msrb.mxu0 %v602_v56  ;;  %v643_v17 = vld [vmem:[%s1220_s5 + $0x48] sm:$0xff] }
  0x19   : > { %510 = vmatpush.msrb.mxu2 %v428_v14  ;;  %654 = vmatpush.msrb.mxu1 %v649_v9  ;;  %v646_v14 = vld [vmem:[%s1220_s5 + $0x60] sm:$0xff]  ;;  %v723_v56 = vld [vmem:[%s1224_s9 + $0x28] sm:$0xff] }
  0x1a   : > { %541 = vmatpush.msra.mxu3 %v532_v20  ;;  %624 = vmatpush.msrb.mxu0 %v601_v57  ;;  %v642_v20 = vld [vmem:[%s1220_s5 + $0x40] sm:$0xff] }
  0x1b   : > { %511 = vmatpush.msrb.mxu2 %v425_v15  ;;  %v645_v15 = vld [vmem:[%s1220_s5 + $0x58] sm:$0xff]  ;;  %v722_v57 = vld [vmem:[%s1224_s9 + $0x20] sm:$0xff] }
  0x1c   : > { %542 = vmatpush.msra.mxu3 %v531_v22 }
  0x1e   : > { %543 = vmatpush.msra.mxu3 %v530_v23  ;;  %v641_v23 = vld [vmem:[%s1220_s5 + $0x38] sm:$0xff] }
  0x1f   : > { %393 = vxpose.xlu0.b32.cont [3/4] (short) (narrow) %v389_v10, 16  ;;  %v648_v10 = vld [vmem:[%s1220_s5 + $0x70] sm:$0xff] }
  0x20   : > { %544 = vmatpush.msra.mxu3 %v529_v24  ;;  %655 = vmatpush.msrb.mxu1 %v648_v10 }
  0x22   : > { %545 = vmatpush.msra.mxu3 %v528_v25  ;;  %656 = vmatpush.msrb.mxu1 %v647_v12  ;;  %v893_v12 = vld [vmem:[%s1225_s10] ss:$0 sm:$0xff] }
  0x24   : > { %546 = vmatpush.msra.mxu3 %v527_v27  ;;  %657 = vmatpush.msrb.mxu1 %v646_v14 }
  0x26   : > { %547 = vmatpush.msra.mxu3 %v526_v28  ;;  %658 = vmatpush.msrb.mxu1 %v645_v15  ;;  %v640_v28 = vld [vmem:[%s1220_s5 + $0x30] sm:$0xff] }
  0x27   : > { %394 = vxpose.xlu0.b32.end [4/4] (short) (narrow) %v390_v11, 16 }
  0x28   : > { %548 = vmatpush.msra.mxu3 %v525_v29  ;;  %659 = vmatpush.msrb.mxu1 %v644_v16 }
  0x2a   : > { %549 = vmatpush.msra.mxu3 %v524_v30  ;;  %660 = vmatpush.msrb.mxu1 %v643_v17  ;;  %v639_v30 = vld [vmem:[%s1220_s5 + $0x28] sm:$0xff] }
  0x2c   : > { %550 = vmatpush.msra.mxu3 %v523_v31  ;;  %661 = vmatpush.msrb.mxu1 %v642_v20 }
  0x2e   : > { %551 = vmatpush.msra.mxu3 %v522_v32  ;;  %662 = vmatpush.msrb.mxu1 %v641_v23 }
  0x30   : > { %552 = vmatpush.msra.mxu3 %v521_v33  ;;  %663 = vmatpush.msrb.mxu1 %v640_v28  ;;  %v638_v33 = vld [vmem:[%s1220_s5 + $0x20] sm:$0xff] }
  0x32   : > { %664 = vmatpush.msrb.mxu1 %v639_v30 }
  0x34   : > { %665 = vmatpush.msrb.mxu1 %v638_v33 }
  0xb3   : > { %v1035_v21 = vpop.trf.xlu0 }
  0xb4   : > { %862 = vmatmul.msk.f32.vlgmr.msra.gmra.mxu0 %vm443_vm0, %v1035_v21  ;;  %864 = vmatmul.msk.f32.vlgmr.msra.gmra.mxu1 %vm443_vm0, %v1035_v21 }
  0xbb   : > { %v1053_v26 = vpop.trf.xlu0 }
  0xbc   : > { %863 = vmatmul.msk.f32.vlgmr.msra.gmra.mxu2 %vm443_vm0, %v1053_v26  ;;  %865 = vmatmul.msk.f32.gmra.mxu1 %vm443_vm0, %v1053_v26 }
  0xc4   : > { %866 = vmatmul.msk.f32.vlgmr.msrb.gmra.mxu2 %vm443_vm0, %v1035_v21 }
  0xcc   : > { %867 = vmatmul.msk.f32.gmra.mxu2 %vm443_vm0, %v1053_v26 }
 0x131   : > { %v467_v37 = vpop.f32.mrf.mxu0  ;;  %v490_v38 = vpop.f32.mrf.mxu1 }
 0x132   : > { %v468_v39 = vadd.f32 %v467_v37, %v437_v35  ;;  %v491_v40 = vadd.f32 %v490_v38, %v438_v36  ;;  %v637_v37 = vld [vmem:[%s1220_s5 + $0x18] sm:$0xff]  ;;  %v636_v38 = vld [vmem:[%s1220_s5 + $0x10] sm:$0xff] }
 0x133   : > { %666 = vmatpush.msrb.mxu1 %v637_v37 }
 0x134   : > { %v519_v41 = vmul.f32 %v491_v40, %v468_v39  ;;  %v635_v40 = vld [vmem:[%s1220_s5 + $0x8] sm:$0xff] }
 0x135   : > { %667 = vmatpush.msrb.mxu1 %v636_v38 }
 0x136   : > { %553 = vmatmul.f32.vlgmr.msra.gmra.mxu3 %v519_v41  ;;  %v634_v41 = vld [vmem:[%s1220_s5] sm:$0xff] }
 0x137   : > { %668 = vmatpush.msrb.mxu1 %v635_v40 }
 0x139   : > { %v493_v42 = vpop.f32.mrf.mxu1  ;;  %669 = vmatpush.msrb.mxu1 %v634_v41 }
 0x13a   : > { %v494_v44 = vadd.f32 %v493_v42, %v438_v36  ;;  %v682_v42 = vld [vmem:[%s1222_s7 + $0x18] sm:$0xff] }
 0x13b   : > { %705 = vmatpush.msra.mxu2 %v682_v42 }
 0x13f   : > { %v470_v43 = vpop.f32.mrf.mxu2 }
 0x140   : > { %v471_v45 = vadd.f32 %v470_v43, %v437_v35  ;;  %v681_v43 = vld [vmem:[%s1222_s7 + $0x10] sm:$0xff] }
 0x141   : > { %706 = vmatpush.msra.mxu2 %v681_v43 }
 0x142   : > { %v520_v46 = vmul.f32 %v494_v44, %v471_v45  ;;  %v680_v44 = vld [vmem:[%s1222_s7 + $0x8] sm:$0xff] }
 0x143   : > { %707 = vmatpush.msra.mxu2 %v680_v44 }
 0x144   : > { %556 = vmatmul.f32.gmra.mxu3 %v520_v46  ;;  %v439_v46 = vperm.slane %v1087_v34, 2  ;;  %v724_v34 = vld [vmem:[%s1224_s9 + $0x30] sm:$0xff] }
 0x147   : > { %v513_v45 = vpop.f32.mrf.mxu2 }
 0x1b9   : > { %v554_v47 = vpop.f32.mrf.mxu3 }
 0x1ba   : > { %v561_v49 = vsel %vm560_vm1, %v554_v47, -inf }
 0x1c7   : > { %v557_v48 = vpop.f32.mrf.mxu3 }
 0x1c8   : > { %v562_v50 = vsel %vm560_vm1, %v557_v48, -inf }
 0x1c9   : > { %v563_v51 = vmax.f32 %v561_v49, %v562_v50  ;;  %v516_v50 = vpop.f32.mrf.mxu2 }
 0x1cb   : > { %v564_v52 = vrot.slane %v563_v51, 4 }
 0x1cd   : > { %v565_v53 = vmax.f32 %v563_v51, %v564_v52  ;;  %v517_v51 = vadd.f32 %v516_v50, %v439_v46 }
 0x1cf   : > { %v566_v54 = vrot.slane %v565_v53, 2 }
 0x1d1   : > { %v567_v55 = vmax.f32 %v565_v53, %v566_v54  ;;  %v679_v54 = vld [vmem:[%s1222_s7] sm:$0xff] }
 0x1d2   : > { %708 = vmatpush.msra.mxu2 %v679_v54 }
 0x1d3   : > { %v568_v58 = vrot.slane %v567_v55, 1 }
 0x1d5   : > { %v569_v59 = vmax.f32 %v567_v55, %v568_v58  ;;  %v725_v55 = vld [vmem:[%s1224_s9 + $0x38] sm:$0xff] }
 0x1d6   : > { %745 = vmatpush.msra.mxu0 %v725_v55  ;;  %v721_v58 = vld [vmem:[%s1224_s9 + $0x18] sm:$0xff] }
 0x1d7   : > { %v570_v60 = vsub.f32 %v554_v47, %v569_v59  ;;  %v571_v61 = vsub.f32 %v557_v48, %v569_v59  ;;  %v514_v47 = vadd.f32 %v513_v45, %v439_v46  ;;  %v720_v59 = vld [vmem:[%s1224_s9 + $0x10] sm:$0xff] }
 0x1d8   : > { %746 = vmatpush.msra.mxu0 %v724_v34 }
 0x1d9   : > { %v572_v62 = vmul.f32 1.442695, %v570_v60  ;;  %v574_v63 = vmul.f32 1.442695, %v571_v61  ;;  %v891_v60 = vld [vmem:[%s1221_s6] ss:$0 sm:$0xff] }
 0x1da   : > { %747 = vmatpush.msra.mxu0 %v723_v56 }
 0x1db   : > { %894 = vpow2.f32 %v572_v62 }
 0x1dc   : > { %896 = vpow2.f32 %v574_v63  ;;  %748 = vmatpush.msra.mxu0 %v722_v57 }
 0x1de   : > { %749 = vmatpush.msra.mxu0 %v721_v58 }
 0x1e0   : > { %750 = vmatpush.msra.mxu0 %v720_v59 }
 0x1e1   : > { %v895_v0 = vpop.eup %894 }
 0x1e2   : > { %v897_v1 = vpop.eup %896  ;;  %v576_v2 = vsel %vm560_vm1, %v895_v0, 0.0 }
 0x1e3   : > { %v577_v3 = vsel %vm560_vm1, %v897_v1, 0.0 }
 0x1e4   : > { %v578_v4 = vadd.f32 %v577_v3, %v576_v2  ;;  %v719_v3 = vld [vmem:[%s1224_s9 + $0x8] sm:$0xff] }
 0x1e5   : > { %751 = vmatpush.msra.mxu0 %v719_v3 }
 0x1e6   : > { %v579_v5 = vrot.slane %v578_v4, 4 }
 0x1e8   : > { %v580_v6 = vadd.f32 %v579_v5, %v578_v4  ;;  %v718_v4 = vld [vmem:[%s1224_s9] sm:$0xff] }
 0x1e9   : > { %752 = vmatpush.msra.mxu0 %v718_v4  ;;  %v892_v5 = vld [vmem:[%s1223_s8] ss:$0 sm:$0xff] }
 0x1ea   : > { %v581_v7 = vrot.slane %v580_v6, 2 }
 0x1ec   : > { %v582_v8 = vadd.f32 %v581_v7, %v580_v6 }
 0x1ee   : > { %v583_v11 = vrot.slane %v582_v8, 1 }
 0x1f0   : > { %v584_v13 = vadd.f32 %v583_v11, %v582_v8 }
 0x1f2   : > { %898 = vrcp.f32 %v584_v13  ;;  %v596_v24 = vand.u32 2147483648, %v584_v13  ;;  %v594_v27 = vand.u32 2147483647, %v584_v13  ;;  %vm590_vm3 = vweird.f32 %v584_v13 }
 0x1f4   : > { %v597_v31 = vor.u32 1.1754944e-38, %v596_v24  ;;  %vm595_vm5 = vcmp.eq.f32.partialorder %v594_v27, 8.507059e+37 }
 0x1f8   : > { %v899_v18 = vpop.eup %898 }
 0x1f9   : > { %v586_v19 = vmul.f32 %v899_v18, %v584_v13  ;;  %vm591_vm2 = vweird.f32 %v899_v18 }
 0x1fa   : > { %vm592_vm4 = vmor %vm590_vm3, %vm591_vm2 }
 0x1fb   : > { %v587_v22 = vsub.f32 1.0, %v586_v19 }
 0x1fd   : > { %v588_v25 = vmul.f32 %v899_v18, %v587_v22 }
 0x1ff   : > { %v589_v29 = vadd.f32 %v899_v18, %v588_v25 }
 0x201   : > { %v593_v32 = vsel %vm592_vm4, %v899_v18, %v589_v29 }
 0x202   : > { %v598_v35 = vsel %vm595_vm5, %v597_v31, %v593_v32 }
 0x203   : > { %v599_v36 = vmul.f32 %v895_v0, %v598_v35  ;;  %v600_v39 = vmul.f32 %v897_v1, %v598_v35 }
 0x205   : > { %868 = vmatmul.msk.f32.vlgmr.msrb.gmra.mxu0 %vm560_vm1, %v599_v36 }
 0x20d   : > { %869 = vmatmul.msk.f32.gmra.mxu0 %vm560_vm1, %v600_v39 }
 0x282   : > { %v626_v48 = vpop.f32.mrf.mxu0 }
 0x283   : > { %v632_v49 = vmul.f32 %v626_v48, %v514_v47 }
 0x285   : > { %670 = vmatmul.f32.vlgmr.msrb.gmra.mxu1 %v632_v49 }
 0x28a   : > { %v629_v52 = vpop.f32.mrf.mxu0 }
 0x28b   : > { %v633_v53 = vmul.f32 %v629_v52, %v517_v51 }
 0x28d   : > { %673 = vmatmul.f32.gmra.mxu1 %v633_v53 }
 0x302   : > { %v671_v61 = vpop.f32.mrf.mxu1 }
 0x303   : > { %v672_v62 = vadd.f32 %v891_v60, %v671_v61 }
 0x305   : > { %v677_v63 = vadd.f32 %v672_v62, %v1035_v21 }
 0x307   : > { %870 = vmatmul.msk.f32.vlgmr.msra.gmra.mxu2 %vm443_vm0, %v677_v63 }
 0x30a   : > { %v674_v0 = vpop.f32.mrf.mxu1 }
 0x30b   : > { %v675_v1 = vadd.f32 %v891_v60, %v674_v0 }
 0x30d   : > { %v678_v2 = vadd.f32 %v675_v1, %v1053_v26 }
 0x30f   : > { %871 = vmatmul.msk.f32.gmra.mxu2 %vm443_vm0, %v678_v2 }
 0x38a   : > { %v710_v6 = vpop.f32.mrf.mxu2 }
 0x38b   : > { %v711_v7 = vadd.f32 %v892_v5, %v710_v6 }
 0x38d   : > { %v716_v8 = vmax.f32 %v711_v7, 0.0 }
 0x38f   : > { %872 = vmatmul.msk.f32.vlgmr.msra.gmra.mxu0 %vm730_vm6, %v716_v8 }
 0x392   : > { %v713_v9 = vpop.f32.mrf.mxu2 }
 0x393   : > { %v714_v10 = vadd.f32 %v892_v5, %v713_v9 }
 0x395   : > { %v717_v11 = vmax.f32 %v714_v10, 0.0 }
 0x397   : > { %873 = vmatmul.msk.f32.gmra.mxu0 %vm730_vm6, %v717_v11 }
 0x40c   : > { %v754_v13 = vpop.f32.mrf.mxu0 }
 0x40d   : > { %v755_v14 = vadd.f32 %v893_v12, %v754_v13 }
 0x40f   : > { %v760_v15 = vadd.f32 %v755_v14, %v1035_v21 }
 0x411   : > { %762 = vxpose.xlu1.b32.start [1/2] (short) (narrow) %v760_v15, 32 }
 0x414   : > { %v757_v16 = vpop.f32.mrf.mxu0 }
 0x415   : > { %v758_v17 = vadd.f32 %v893_v12, %v757_v16 }
 0x417   : > { %v761_v18 = vadd.f32 %v758_v17, %v1053_v26 }
 0x419   : > { %763 = vxpose.xlu1.b32.end [2/2] (short) (narrow) %v761_v18, 32 }
 0x4b5   : > { %v778_v19 = vpop.trf.xlu1 }
 0x4b6   : > { %794 = vst.msk [vmem:[%s386_s20] sm:$0xff] %vm560_vm1, %v778_v19 }
 0x4bd   : > { %v779_v20 = vpop.trf.xlu1 }
 0x4be   : > { %795 = vst.msk [vmem:[%s386_s20 + $0x8] sm:$0xff] %vm560_vm1, %v779_v20 }
 0x4c5   : > { %v780_v22 = vpop.trf.xlu1 }
 0x4c6   : > { %796 = vst.msk [vmem:[%s386_s20 + $0x10] sm:$0xff] %vm560_vm1, %v780_v22 }
 0x4cd   : > { %v781_v21 = vpop.trf.xlu1 }
 0x4ce   : > { %797 = vst.msk [vmem:[%s386_s20 + $0x18] sm:$0xff] %vm560_vm1, %v781_v21 }
 0x4cf PF: > { %s21_s17 = sadd.s32 1, %s906_s17  }
 0x4d0   : > { %p18_p4 = scmp.ge.s32.totalorder %s21_s17, 4  }
 0x4d2   :  { %20 = sbr.rel (!%p18_p4) target bundleno = 1 (0x1), region = 94 }

</bundles_post_ra>
